<compile_context>
chip_gen: v7x
topology: tpu7x:2x2x1
jax: 0.10.0
libtpu: 0.0.40
codegen_flags: <defaults>
</compile_context>

<pallas_src>
import numpy as np
import jax
import jax.numpy as jnp
from jax import lax
from jax.experimental import pallas as pl
from jax.experimental.pallas import tpu as pltpu

LANE = 128
TK_GRAN = 512                 # K-tile granularity (keeps (8,128)/bf16 tiling happy)
WEIGHT_TILE_BYTES = 8 << 20   # ~8 MiB bf16 weight tile per grid step


def _round_up(x, m):
    return ((x + m - 1) // m) * m


def _physical_vmem_bytes():
    phys = 64 << 20                      # conservative default (v7x per-TC VMEM)
    try:
        info = pltpu.get_tpu_info()
        phys = int(getattr(info, "vmem_capacity_bytes", phys) or phys)
    except Exception:
        pass
    return phys


def _backbone_vmem_need(B, tk, tn):
    """Double-buffered working set of the backbone call (bytes)."""
    b16 = _round_up(max(B, 16), 16)      # bf16 sublane padding
    b8 = _round_up(max(B, 8), 8)         # f32 sublane padding
    w_buf = 2 * tk * tn * 2              # streamed weight tile (bf16, x2 buffers)
    img_buf = 2 * b16 * tk * 2           # streamed image tile  (bf16, x2 buffers)
    bias_buf = 2 * 8 * tn * 4
    out_buf = 2 * b8 * tn * 4
    acc = b8 * tn * 4
    return w_buf + img_buf + bias_buf + out_buf + acc


def backbone_kernel(imgs_ref, w_ref, b_ref, out_ref, acc_ref):
    """K-streamed linear projection: out[:, col_block] = imgs @ W[:, col_block] + b."""
    k = pl.program_id(1)

    @pl.when(k == 0)
    def _():
        acc_ref[...] = jnp.zeros_like(acc_ref)

    acc_ref[...] += jnp.dot(imgs_ref[...], w_ref[...],
                            preferred_element_type=jnp.float32)

    @pl.when(k == pl.num_programs(1) - 1)
    def _():
        out_ref[...] = acc_ref[...] + b_ref[...]


def loss_kernel(v_ref, t_ref, codes_col_ref, codes_row_ref, scal_ref, out_ref):
    """Fused CLIP-style loss epilogue on the projected embeddings."""
    B = v_ref.shape[0]

    # L2-normalize visual / text embeddings (zero-padded feature columns
    # contribute nothing to the norms or the dot products).
    v = v_ref[...]
    v = v * lax.rsqrt(jnp.sum(v * v, axis=1, keepdims=True))
    t = t_ref[...]
    t = t * lax.rsqrt(jnp.sum(t * t, axis=1, keepdims=True))

    # Single similarity matmul; bf16 operands, f32 accumulation.
    # logits[i, j] = exp(logit_scale) * <t_i, v_j>  == logits_per_text.
    logits = jnp.einsum('bd,cd->bc', t.astype(jnp.bfloat16),
                        v.astype(jnp.bfloat16),
                        preferred_element_type=jnp.float32)
    logits = logits * jnp.exp(scal_ref[0])

    # Row-wise (text losses) and column-wise (image losses) log-softmax,
    # each computed exactly once.
    zr = logits - jnp.max(logits, axis=1, keepdims=True)
    lsm_row = zr - jnp.log(jnp.sum(jnp.exp(zr), axis=1, keepdims=True))
    zc = logits - jnp.max(logits, axis=0, keepdims=True)
    lsm_col = zc - jnp.log(jnp.sum(jnp.exp(zc), axis=0, keepdims=True))

    # Boolean masks only -- no BxB f32 target matrices are materialized.
    row = lax.broadcasted_iota(jnp.int32, (B, B), 0)
    col = lax.broadcasted_iota(jnp.int32, (B, B), 1)
    diag = row == col
    cls_eq = codes_col_ref[:, 0:1] == codes_row_ref[0:1, :]
    cat_eq = codes_col_ref[:, 1:2] == codes_row_ref[1:2, :]

    inv_b = 1.0 / B
    loss1 = -jnp.sum(jnp.where(diag, lsm_row, 0.0)) * inv_b   # CE(logits_t, arange)
    loss2 = -jnp.sum(jnp.where(diag, lsm_col, 0.0)) * inv_b   # CE(logits_i, arange)

    cls_cnt = jnp.sum(jnp.where(cls_eq, 1.0, 0.0), axis=1, keepdims=True)
    loss3 = -jnp.sum(jnp.sum(jnp.where(cls_eq, lsm_row, 0.0), axis=1,
                             keepdims=True) / cls_cnt) * inv_b
    loss4 = -jnp.sum(jnp.sum(jnp.where(cls_eq, lsm_col, 0.0), axis=1,
                             keepdims=True) / cls_cnt) * inv_b
    loss6 = -jnp.sum(jnp.where(cat_eq, lsm_col, 0.0)) * inv_b
    # loss5 (CE(logits_per_text, cat_target)) is dead in the reference; omitted.

    clip_loss = 0.5 * (loss1 + loss2)
    cls_loss = 0.5 * (loss3 + loss4)
    cat_loss = 0.5 * (loss4 + loss6)      # reference quirk: uses loss4, not loss5

    s0 = scal_ref[1]
    s1 = scal_ref[2]
    s2 = scal_ref[3]
    out_ref[0, 0] = (clip_loss * jnp.exp(-s0)
                     + cls_loss * jnp.exp(-s1)
                     + cat_loss * jnp.exp(-s2)) + (s0 + s1 + s2)


def amodel_forward(images, texts_embeddings, cls, cat,
                   w_vis, b_vis, logit_scale, s_hats):
    B = images.shape[0]
    K = int(np.prod(images.shape[1:]))
    D = w_vis.shape[1]

    # Lane-dense feature dim: multiple of 128 (multiple of 256 once D > 128 so
    # the MXU N dimension is filled on v6e/v7x and a clean 2-way column split
    # is possible).
    d_pad = LANE if D <= LANE else _round_up(D, 2 * LANE)
    nd = 2 if d_pad >= 2 * LANE else 1   # column blocks ("parallel" -> 2 TCs on v7x)
    tn = d_pad // nd

    # Per-chip VMEM budget: physical minus headroom, capped (112 MiB on
    # 128-MiB chips, 48 MiB on 64-MiB v7x).
    phys = _physical_vmem_bytes()
    cap = max(min(phys - (16 << 20), 112 << 20), 32 << 20)

    # K tile: ~8 MiB of bf16 weights per grid step so per-step overhead is
    # negligible against the HBM weight stream; shrink until the
    # double-buffered working set fits the VMEM cap.
    k_ceil = _round_up(K, TK_GRAN)
    tk = min(max(_round_up(WEIGHT_TILE_BYTES // (tn * 2), TK_GRAN), TK_GRAN), k_ceil)
    while tk > TK_GRAN and _backbone_vmem_need(B, tk, tn) + (4 << 20) > cap:
        tk -= TK_GRAN
    k_pad = _round_up(K, tk)
    nk = k_pad // tk

    vmem_limit = int(min(cap, max(_backbone_vmem_need(B, tk, tn) + (4 << 20),
                                  32 << 20)))

    # bf16 MXU operands; f32 accumulation happens in the kernel.
    # TODO(synk): for real backbone sizes, W_vis could be streamed as int8
    # (v5e/v6e) / fp8 (v7x) with per-column scales to halve the HBM stream.
    imgs = jnp.pad(images.reshape(B, K).astype(jnp.bfloat16),
                   ((0, 0), (0, k_pad - K)))
    w = jnp.pad(w_vis.astype(jnp.bfloat16), ((0, k_pad - K), (0, d_pad - D)))
    b = jnp.pad(b_vis.astype(jnp.float32), ((0, d_pad - D),)).reshape(1, d_pad)
    txt = jnp.pad(texts_embeddings.astype(jnp.float32),
                  ((0, 0), (0, d_pad - D)))

    # cls/cat codes as row- and column-vectors (equality targets built in-kernel,
    # no O(B^2) HBM->VMEM traffic).
    codes_row = jnp.stack([cls.astype(jnp.float32), cat.astype(jnp.float32)])  # (2,B)
    codes_col = codes_row.T                                                    # (B,2)
    scal = jnp.concatenate([jnp.reshape(logit_scale, (1,)).astype(jnp.float32),
                            jnp.reshape(s_hats, (3,)).astype(jnp.float32)])    # (4,)

    # --- call 1: K-streamed backbone projection -> visual embeddings [B, d_pad]
    backbone_grid = pltpu.PrefetchScalarGridSpec(
        num_scalar_prefetch=0,
        grid=(nd, nk),
        in_specs=[
            pl.BlockSpec((B, tk), lambda j, k: (0, k)),    # image K-tiles
            pl.BlockSpec((tk, tn), lambda j, k: (k, j)),   # weight K-tiles (streamed)
            # On v7x, if the weight DMA is still exposed after enlarging tk,
            # add pipeline_mode=pl.Buffered(3) on the weight spec above.
            pl.BlockSpec((1, tn), lambda j, k: (0, j)),    # bias column block
        ],
        out_specs=pl.BlockSpec((B, tn), lambda j, k: (0, j)),
        scratch_shapes=[pltpu.VMEM((B, tn), jnp.float32)],
    )
    vproj = pl.pallas_call(
        backbone_kernel,
        out_shape=jax.ShapeDtypeStruct((B, d_pad), jnp.float32),
        grid_spec=backbone_grid,
        compiler_params=pltpu.CompilerParams(
            dimension_semantics=("parallel", "arbitrary"),
            vmem_limit_bytes=vmem_limit),
    )(imgs, w, b)

    # --- call 2: tiny fused loss epilogue (runs once) ---
    smem = pl.BlockSpec(memory_space=pltpu.MemorySpace.SMEM)
    loss_grid = pltpu.PrefetchScalarGridSpec(
        num_scalar_prefetch=0,
        grid=(1,),
        in_specs=[
            pl.BlockSpec((B, d_pad), lambda i: (0, 0)),    # visual projection
            pl.BlockSpec((B, d_pad), lambda i: (0, 0)),    # text embeddings
            pl.BlockSpec((B, 2), lambda i: (0, 0)),        # [cls, cat] column view
            pl.BlockSpec((2, B), lambda i: (0, 0)),        # [cls; cat] row view
            smem,                                          # [logit_scale, s_hats]
        ],
        out_specs=smem,
    )
    out = pl.pallas_call(
        loss_kernel,
        out_shape=jax.ShapeDtypeStruct((1, 1), jnp.float32),
        grid_spec=loss_grid,
        compiler_params=pltpu.CompilerParams(
            dimension_semantics=("arbitrary",)),
    )(vproj, txt, codes_col, codes_row, scal)
    return out[0, 0]


def amodel_reference(images, texts_embeddings, cls, cat,
                     w_vis, b_vis, logit_scale, s_hats):
    """Pure-JAX reference mirroring the kernel's bf16 MXU operand choices."""
    B = images.shape[0]
    imgs = images.reshape(B, -1).astype(jnp.bfloat16)
    w = w_vis.astype(jnp.bfloat16)
    v = jnp.dot(imgs, w, preferred_element_type=jnp.float32) + b_vis
    v = v * lax.rsqrt(jnp.sum(v * v, axis=1, keepdims=True))
    t = texts_embeddings.astype(jnp.float32)
    t = t * lax.rsqrt(jnp.sum(t * t, axis=1, keepdims=True))
    logits_t = jnp.dot(t.astype(jnp.bfloat16), v.astype(jnp.bfloat16).T,
                       preferred_element_type=jnp.float32) * jnp.exp(logit_scale)
    logits_i = logits_t.T

    def ce(logits, target):
        return -jnp.sum(target * jax.nn.log_softmax(logits, axis=1)) / logits.shape[0]

    eye = jnp.eye(B, dtype=jnp.float32)
    cls_t = (cls[None, :] == cls[:, None]).astype(jnp.float32)
    cat_t = (cat[None, :] == cat[:, None]).astype(jnp.float32)
    cls_t = cls_t / jnp.sum(cls_t, axis=1, keepdims=True)

    loss1, loss2 = ce(logits_t, eye), ce(logits_i, eye)
    loss3, loss4 = ce(logits_t, cls_t), ce(logits_i, cls_t)
    loss6 = ce(logits_i, cat_t)
    clip_loss = (loss1 + loss2) / 2.0
    cls_loss = (loss3 + loss4) / 2.0
    cat_loss = (loss4 + loss6) / 2.0
    loss_all = jnp.stack([clip_loss, cls_loss, cat_loss])
    return jnp.sum(loss_all * jnp.exp(-s_hats)) + jnp.sum(s_hats)


if __name__ == "__main__":
    B, C, H, W, D = 8, 4, 16, 16, 32

    key = jax.random.PRNGKey(0)
    k1, k2, k3, k4, k5 = jax.random.split(key, 5)

    images = jax.random.normal(k1, (B, C, H, W), jnp.float32)
    texts_embeddings = jax.random.normal(k2, (B, D), jnp.float32)
    cls = jax.random.randint(k3, (B,), 0, 3)
    cat = jax.random.randint(k4, (B,), 0, 2)

    # deterministic parameter init (synthetic backbone = linear projection)
    w_vis = jax.random.normal(k5, (C * H * W, D), jnp.float32) * 0.02
    b_vis = jnp.zeros((D,), jnp.float32)
    logit_scale = jnp.asarray(np.log(1.0 / 0.07), jnp.float32)  # nn.Parameter init
    s_hats = jnp.zeros((3,), jnp.float32)                       # nn.Parameter init

    total_loss = amodel_forward(images, texts_embeddings, cls, cat,
                                w_vis, b_vis, logit_scale, s_hats)
    total_loss = jax.block_until_ready(total_loss)

    ref_loss = jax.block_until_ready(
        amodel_reference(images, texts_embeddings, cls, cat,
                         w_vis, b_vis, logit_scale, s_hats))

    assert jnp.isfinite(total_loss), "loss is not finite"
    assert np.allclose(float(total_loss), float(ref_loss), rtol=1e-3, atol=1e-3), \
        f"kernel {float(total_loss)} vs reference {float(ref_loss)}"
    print("KERNEL_OK")
</pallas_src>

<mosaic_0001>
module attributes {stable_mosaic.version = 11 : i64} {
  func.func @backbone_kernel(%arg0: i32, %arg1: i32, %arg2: memref<8x1024xbf16, #tpu.memory_space<vmem>>, %arg3: memref<1024x128xbf16, #tpu.memory_space<vmem>>, %arg4: memref<1x128xf32, #tpu.memory_space<vmem>>, %arg5: memref<8x128xf32, #tpu.memory_space<vmem>>, %arg6: memref<8x128xf32, #tpu.memory_space<vmem>>) attributes {dimension_semantics = [#tpu.dimension_semantics<parallel>, #tpu.dimension_semantics<arbitrary>], iteration_bounds = array<i64: 1, 1>, scalar_prefetch = 0 : i64, scratch_operands = 1 : i64, tpu.core_type = #tpu.core_type<tc>, window_params = [{transform_indices = @transform_0, window_bounds = array<i64: 8, 1024>}, {transform_indices = @transform_1, window_bounds = array<i64: 1024, 128>}, {transform_indices = @transform_2, window_bounds = array<i64: 1, 128>}, {transform_indices = @transform_3, window_bounds = array<i64: 8, 128>}]} {
    %c0_i32 = arith.constant 0 : i32
    %0 = arith.cmpi eq, %arg1, %c0_i32 : i32
    %1 = arith.extui %0 : i1 to i32
    %c0_i32_0 = arith.constant 0 : i32
    %2 = arith.cmpi ne, %1, %c0_i32_0 : i32
    scf.if %2 {
      %cst_10 = arith.constant 0.000000e+00 : f32
      %12 = vector.broadcast %cst_10 : f32 to vector<8x128xf32>
      %c0_11 = arith.constant 0 : index
      %c0_12 = arith.constant 0 : index
      %13 = vector.load %arg6[%c0_11, %c0_12] : memref<8x128xf32, #tpu.memory_space<vmem>>, vector<8x128xf32>
      tpu.vector_store %arg6[%c0_11, %c0_12], %12 {strides = array<i32>} : memref<8x128xf32, #tpu.memory_space<vmem>>, vector<8x128xf32>,
    } else {
    }
    %c0 = arith.constant 0 : index
    %c0_1 = arith.constant 0 : index
    %3 = vector.load %arg6[%c0, %c0_1] : memref<8x128xf32, #tpu.memory_space<vmem>>, vector<8x128xf32>
    %c0_2 = arith.constant 0 : index
    %c0_3 = arith.constant 0 : index
    %4 = vector.load %arg2[%c0_2, %c0_3] : memref<8x1024xbf16, #tpu.memory_space<vmem>>, vector<8x1024xbf16>
    %c0_4 = arith.constant 0 : index
    %c0_5 = arith.constant 0 : index
    %5 = vector.load %arg3[%c0_4, %c0_5] : memref<1024x128xbf16, #tpu.memory_space<vmem>>, vector<1024x128xbf16>
    %cst = arith.constant dense<0.000000e+00> : vector<8x128xf32>
    %6 = tpu.matmul %4, %5, %cst {dimension_numbers = #tpu.dot_dimension_numbers<[1], [0], [0], [1], [0, 0, 1, 1], [], []>} : vector<8x1024xbf16>, vector<1024x128xbf16>, vector<8x128xf32> -> vector<8x128xf32>
    %7 = arith.addf %3, %6 : vector<8x128xf32>
    %c0_6 = arith.constant 0 : index
    %c0_7 = arith.constant 0 : index
    %8 = vector.load %arg6[%c0_6, %c0_7] : memref<8x128xf32, #tpu.memory_space<vmem>>, vector<8x128xf32>
    tpu.vector_store %arg6[%c0_6, %c0_7], %7 {strides = array<i32>} : memref<8x128xf32, #tpu.memory_space<vmem>>, vector<8x128xf32>,
    %c0_i32_8 = arith.constant 0 : i32
    %9 = arith.cmpi eq, %arg1, %c0_i32_8 : i32
    %10 = arith.extui %9 : i1 to i32
    %c0_i32_9 = arith.constant 0 : i32
    %11 = arith.cmpi ne, %10, %c0_i32_9 : i32
    scf.if %11 {
      %c0_10 = arith.constant 0 : index
      %c0_11 = arith.constant 0 : index
      %12 = vector.load %arg6[%c0_10, %c0_11] : memref<8x128xf32, #tpu.memory_space<vmem>>, vector<8x128xf32>
      %c0_12 = arith.constant 0 : index
      %c0_13 = arith.constant 0 : index
      %13 = vector.load %arg4[%c0_12, %c0_13] : memref<1x128xf32, #tpu.memory_space<vmem>>, vector<1x128xf32>
      %14 = vector.broadcast %13 : vector<1x128xf32> to vector<8x128xf32>
      %15 = arith.addf %12, %14 : vector<8x128xf32>
      %c0_14 = arith.constant 0 : index
      %c0_15 = arith.constant 0 : index
      %16 = vector.load %arg5[%c0_14, %c0_15] : memref<8x128xf32, #tpu.memory_space<vmem>>, vector<8x128xf32>
      tpu.vector_store %arg5[%c0_14, %c0_15], %15 {strides = array<i32>} : memref<8x128xf32, #tpu.memory_space<vmem>>, vector<8x128xf32>,
    } else {
    }
    return
  }
  func.func @transform_0(%arg0: i32, %arg1: i32) -> (i32, i32) {
    %c0_i32 = arith.constant 0 : i32
    %c0_i32_0 = arith.constant 0 : i32
    return %c0_i32, %arg1 : i32, i32
  }
  func.func @transform_1(%arg0: i32, %arg1: i32) -> (i32, i32) {
    %c0_i32 = arith.constant 0 : i32
    return %arg1, %arg0 : i32, i32
  }
  func.func @transform_2(%arg0: i32, %arg1: i32) -> (i32, i32) {
    %c0_i32 = arith.constant 0 : i32
    %c0_i32_0 = arith.constant 0 : i32
    return %c0_i32, %arg0 : i32, i32
  }
  func.func @transform_3(%arg0: i32, %arg1: i32) -> (i32, i32) {
    %c0_i32 = arith.constant 0 : i32
    %c0_i32_0 = arith.constant 0 : i32
    return %c0_i32, %arg0 : i32, i32
  }
}

</mosaic_0001>

<bundles_post_ra>
// kernel: tpu_custom_call.1
= control target key start
LH: loop header
LB: loop body
LE: loop exit
PB: predicated region body
PF: predicated region fallthrough
CT: control target
= control target key end

     0   :  { %8 = vsyncpa [#allocation4], 0  ;;  %s1164_s0 = inlined_call_operand.hbm [shape: bf16[8,1024], index: 0, kind: input, shape index: {}]   ;;  %s1165_s1 = inlined_call_operand.hbm [shape: bf16[1024,128], index: 1, kind: input, shape index: {}]   ;;  %s1166_s2 = inlined_call_operand.vmem [shape: f32[1,128], index: 2, kind: input, shape index: {}]   ;;  %s1167_s3 = inlined_call_operand.hbm [shape: f32[8,128], index: 3, kind: output, shape index: {}]  }
   0x1   :  { %9 = vsyncpa [#allocation7], 0 }
   0x2   :  { %10 = vsyncpa [#allocation5], 0  ;;  %s1093_s12 = smov [#allocation3]   ;;  %s1094_s14 = smov [#allocation6]  }
   0x3   :  { %s17_s13 = sshll.u32 %s1093_s12, 4  ;;  %s26_s15 = sshll.u32 %s1094_s14, 4  ;;  %s18_s13 = int_to_ptr.vmem [resolvable:$true] %s17_s13  ;;  %s1118_s15 = int_to_ptr.vmem [resolvable:$true] %s26_s15 }
   0x4   :  { %s1021_s18 = scalar_lea.hbm %s1164_s0, 512 }
   0x5   :  { %p1022_p0 = scmp.ne.s32.totalorder %s1164_s0, %s1021_s18  ;;  %p1025_p1 = scmp.lt.u32.totalorder %s1021_s18, %s1164_s0 }
   0x7   :  { %p1027_p2 = pnand %p1025_p1, %p1022_p0 }
   0x9   :  { %1030 = shalt.err (!%p1027_p2)
}
   0xa   :  { %s1031_s23 = scalar_lea.vmem %s18_s13, 512  ;;  %p1036_p4 = scmp.lt.s32.totalorder %s18_s13, %s18_s13 }
   0xb   :  { %p1032_p3 = scmp.ne.s32.totalorder %s18_s13, %s1031_s23  ;;  %p1037_p5 = scmp.lt.s32.totalorder %s1031_s23, %s1031_s23 }
   0xd   :  { %p1038_p6 = por %p1037_p5, %p1036_p4 }
   0xf   :  { %p1039_p7 = pnand %p1038_p6, %p1032_p3 }
  0x11   :  { %1042 = shalt.err (!%p1039_p7)
}
  0x12   :  { %20 = dma.hbm_to_vmem [thread:$0]  %s1164_s0, 512, %s18_s13, [#allocation4]  }
  0x13   :  { %s1043_s28 = scalar_lea.hbm %s1165_s1, 8192 }
  0x14   :  { %p1044_p8 = scmp.ne.s32.totalorder %s1165_s1, %s1043_s28  ;;  %p1047_p9 = scmp.lt.u32.totalorder %s1043_s28, %s1165_s1 }
  0x16   :  { %p1049_p10 = pnand %p1047_p9, %p1044_p8 }
  0x18   :  { %1052 = shalt.err (!%p1049_p10)
}
  0x19   :  { %s1053_s6 = scalar_lea.vmem %s1118_s15, 8192  ;;  %p1058_p12 = scmp.lt.s32.totalorder %s1118_s15, %s1118_s15 }
  0x1a   :  { %p1054_p11 = scmp.ne.s32.totalorder %s1118_s15, %s1053_s6  ;;  %p1059_p13 = scmp.lt.s32.totalorder %s1053_s6, %s1053_s6 }
  0x1c   :  { %p1060_p0 = por %p1059_p13, %p1058_p12 }
  0x1e   :  { %p1061_p1 = pnand %p1060_p0, %p1054_p11 }
  0x20   :  { %1064 = shalt.err (!%p1061_p1)
}
  0x21   :  { %s1095_s0 = smov 64   ;;  %s1096_s7 = smov 4  }
  0x22   :  { %32 = dma.hbm_to_vmem [thread:$0]  %s1165_s1, 8192, %s1118_s15, [#allocation7], %s1095_s0, %s1095_s0, %s1096_s7  }
  0x23   :  { %1087 = dma.done.wait [#allocation4], 512  }
  0x24   :  { %1088 = vsyncadd [#allocation4], 4294966784 }
  0x25   :  { %1089 = dma.done.wait [#allocation7], 8192  }
  0x26   :  { %1090 = vsyncadd [#allocation7], 4294959104  ;;  %v949_v0 = vld [vmem:[#allocation6 + $0x40] sm:$0xff]   ;;  %v953_v4 = vld [vmem:[#allocation6 + $0x48] sm:$0xff]   ;;  %s1097_s11 = smov [#allocation8]  }
  0x27   :  { %v950_v1 = vld [vmem:[#allocation6 + $0xc0] sm:$0xff]   ;;  %856 = vmatprep.subr.bf16.mxu0 %v949_v0  ;;  %v954_v5 = vld [vmem:[#allocation6 + $0xc8] sm:$0xff]   ;;  %v957_v8 = vld [vmem:[#allocation6 + $0x50] sm:$0xff]   ;;  %s773_s12 = sshll.u32 %s1097_s11, 4  ;;  %s774_s12 = int_to_ptr.vmem [resolvable:$true] %s773_s12 }
  0x28   :  { %v951_v2 = vld [vmem:[#allocation6] sm:$0xff]   ;;  %878 = vmatprep.subr.bf16.mxu1 %v950_v1  ;;  %v955_v6 = vld [vmem:[#allocation6 + $0x8] sm:$0xff]   ;;  %v958_v9 = vld [vmem:[#allocation6 + $0xd0] sm:$0xff]   ;;  %s1065_s13 = scalar_lea.vmem %s774_s12, 128  ;;  %p1070_p3 = scmp.lt.s32.totalorder %s774_s12, %s774_s12 }
  0x29   :  { %v952_v3 = vld [vmem:[#allocation6 + $0x80] sm:$0xff]   ;;  %857 = vmatpush3.bf16.msra.mxu0 %v951_v2  ;;  %v956_v7 = vld [vmem:[#allocation6 + $0x88] sm:$0xff]   ;;  %v959_v10 = vld [vmem:[#allocation6 + $0x10] sm:$0xff]   ;;  %p1066_p2 = scmp.ne.s32.totalorder %s774_s12, %s1065_s13  ;;  %p1071_p4 = scmp.lt.s32.totalorder %s1065_s13, %s1065_s13 }
  0x2a   :  { %879 = vmatpush3.bf16.msra.mxu1 %v952_v3  ;;  %858 = vmatprep.subr.bf16.mxu0 %v953_v4  ;;  %v960_v11 = vld [vmem:[#allocation6 + $0x90] sm:$0xff]   ;;  %v961_v12 = vld [vmem:[#allocation6 + $0x58] sm:$0xff]   ;;  %v965_v16 = vld [vmem:[#allocation6 + $0x60] sm:$0xff]  }
  0x2b   :  { %880 = vmatprep.subr.bf16.mxu1 %v954_v5  ;;  %v962_v13 = vld [vmem:[#allocation6 + $0xd8] sm:$0xff]   ;;  %v966_v17 = vld [vmem:[#allocation6 + $0xe0] sm:$0xff]   ;;  %v969_v20 = vld [vmem:[#allocation6 + $0x68] sm:$0xff]   ;;  %p1072_p5 = por %p1071_p4, %p1070_p3 }
  0x2c   :  { %v963_v14 = vld [vmem:[#allocation6 + $0x18] sm:$0xff]   ;;  %v967_v18 = vld [vmem:[#allocation6 + $0x20] sm:$0xff]   ;;  %v970_v21 = vld [vmem:[#allocation6 + $0xe8] sm:$0xff]  }
  0x2d   :  { %859 = vmatpush3.bf16.msra.mxu0 %v955_v6  ;;  %v964_v15 = vld [vmem:[#allocation6 + $0x98] sm:$0xff]   ;;  %v968_v19 = vld [vmem:[#allocation6 + $0xa0] sm:$0xff]   ;;  %v971_v22 = vld [vmem:[#allocation6 + $0x28] sm:$0xff]   ;;  %p1073_p6 = pnand %p1072_p5, %p1066_p2 }
  0x2e   :  { %881 = vmatpush3.bf16.msra.mxu1 %v956_v7  ;;  %860 = vmatprep.subr.bf16.mxu0 %v957_v8  ;;  %v972_v23 = vld [vmem:[#allocation6 + $0xa8] sm:$0xff]   ;;  %v973_v24 = vld [vmem:[#allocation6 + $0x70] sm:$0xff]   ;;  %v977_v28 = vld [vmem:[#allocation6 + $0x78] sm:$0xff]  }
  0x2f   :  { %882 = vmatprep.subr.bf16.mxu1 %v958_v9  ;;  %v974_v25 = vld [vmem:[#allocation6 + $0xf0] sm:$0xff]   ;;  %v978_v29 = vld [vmem:[#allocation6 + $0xf8] sm:$0xff]   ;;  %v48_v32 = vld [vmem:[#allocation3] sm:$0xff] }
  0x30   :  { %v975_v26 = vld [vmem:[#allocation6 + $0x30] sm:$0xff]   ;;  %v979_v30 = vld [vmem:[#allocation6 + $0x38] sm:$0xff]   ;;  %v49_v33 = vld [vmem:[#allocation3 + $0x8] sm:$0xff]  ;;  %v783_v34 = vcombine.low %v48_v32, %v48_v32  ;;  %v784_v35 = vcombine.high %v48_v32, %v48_v32 }
  0x31   :  { %861 = vmatpush3.bf16.msra.mxu0 %v959_v10  ;;  %v976_v27 = vld [vmem:[#allocation6 + $0xb0] sm:$0xff]   ;;  %v980_v31 = vld [vmem:[#allocation6 + $0xb8] sm:$0xff]   ;;  %v785_v36 = vcombine.low %v49_v33, %v49_v33  ;;  %v786_v37 = vcombine.high %v49_v33, %v49_v33  ;;  %v985_v38 = vld [vmem:[#allocation6 + $0x140] sm:$0xff]  }
  0x32   :  { %883 = vmatpush3.bf16.msra.mxu1 %v960_v11  ;;  %862 = vmatprep.subr.bf16.mxu0 %v961_v12  ;;  %v986_v39 = vld [vmem:[#allocation6 + $0x1c0] sm:$0xff]   ;;  %v989_v42 = vld [vmem:[#allocation6 + $0x148] sm:$0xff]   ;;  %v993_v46 = vld [vmem:[#allocation6 + $0x150] sm:$0xff]  }
  0x33   :  { %884 = vmatprep.subr.bf16.mxu1 %v962_v13  ;;  %624 = vmatprep.mubr.bf16.mxu0 %v784_v35  ;;  %v987_v40 = vld [vmem:[#allocation6 + $0x100] sm:$0xff]   ;;  %v990_v43 = vld [vmem:[#allocation6 + $0x1c8] sm:$0xff]   ;;  %v994_v47 = vld [vmem:[#allocation6 + $0x1d0] sm:$0xff]  }
  0x34   :  { %664 = vmatprep.mubr.bf16.mxu1 %v786_v37  ;;  %v988_v41 = vld [vmem:[#allocation6 + $0x180] sm:$0xff]   ;;  %v991_v44 = vld [vmem:[#allocation6 + $0x108] sm:$0xff]   ;;  %v995_v48 = vld [vmem:[#allocation6 + $0x110] sm:$0xff]  }
  0x35   :  { %863 = vmatpush3.bf16.msra.mxu0 %v963_v14  ;;  %v992_v45 = vld [vmem:[#allocation6 + $0x188] sm:$0xff]   ;;  %v996_v49 = vld [vmem:[#allocation6 + $0x190] sm:$0xff]   ;;  %v997_v50 = vld [vmem:[#allocation6 + $0x158] sm:$0xff]  }
  0x36   :  { %885 = vmatpush3.bf16.msra.mxu1 %v964_v15  ;;  %864 = vmatprep.subr.bf16.mxu0 %v965_v16  ;;  %v998_v51 = vld [vmem:[#allocation6 + $0x1d8] sm:$0xff]   ;;  %v1001_v54 = vld [vmem:[#allocation6 + $0x160] sm:$0xff]   ;;  %v1005_v58 = vld [vmem:[#allocation6 + $0x168] sm:$0xff]  }
  0x37   :  { %886 = vmatprep.subr.bf16.mxu1 %v966_v17  ;;  %v999_v52 = vld [vmem:[#allocation6 + $0x118] sm:$0xff]   ;;  %v1002_v55 = vld [vmem:[#allocation6 + $0x1e0] sm:$0xff]   ;;  %v1006_v59 = vld [vmem:[#allocation6 + $0x1e8] sm:$0xff]  }
  0x38   :  { %v1000_v53 = vld [vmem:[#allocation6 + $0x198] sm:$0xff]   ;;  %v1003_v56 = vld [vmem:[#allocation6 + $0x120] sm:$0xff]   ;;  %v1007_v60 = vld [vmem:[#allocation6 + $0x128] sm:$0xff]  }
  0x39   :  { %865 = vmatpush3.bf16.msra.mxu0 %v967_v18  ;;  %v1004_v57 = vld [vmem:[#allocation6 + $0x1a0] sm:$0xff]   ;;  %v1008_v61 = vld [vmem:[#allocation6 + $0x1a8] sm:$0xff]   ;;  %v1009_v62 = vld [vmem:[#allocation6 + $0x170] sm:$0xff]  }
  0x3a   :  { %887 = vmatpush3.bf16.msra.mxu1 %v968_v19  ;;  %866 = vmatprep.subr.bf16.mxu0 %v969_v20  ;;  %v1010_v63 = vld [vmem:[#allocation6 + $0x1f0] sm:$0xff]   ;;  %v1013_v2 = vld [vmem:[#allocation6 + $0x178] sm:$0xff]  }
  0x3b   :  { %888 = vmatprep.subr.bf16.mxu1 %v970_v21  ;;  %v1011_v0 = vld [vmem:[#allocation6 + $0x130] sm:$0xff]   ;;  %v1014_v3 = vld [vmem:[#allocation6 + $0x1f8] sm:$0xff]  }
  0x3c   :  { %v1012_v1 = vld [vmem:[#allocation6 + $0x1b0] sm:$0xff]   ;;  %v1015_v4 = vld [vmem:[#allocation6 + $0x138] sm:$0xff]  }
  0x3d   :  { %867 = vmatpush3.bf16.msra.mxu0 %v971_v22  ;;  %v1016_v5 = vld [vmem:[#allocation6 + $0x1b8] sm:$0xff]   ;;  %v50_v6 = vld [vmem:[#allocation3 + $0x10] sm:$0xff] }
  0x3e   :  { %889 = vmatpush3.bf16.msra.mxu1 %v972_v23  ;;  %868 = vmatprep.subr.bf16.mxu0 %v973_v24  ;;  %v787_v7 = vcombine.low %v50_v6, %v50_v6  ;;  %v788_v8 = vcombine.high %v50_v6, %v50_v6  ;;  %v51_v9 = vld [vmem:[#allocation3 + $0x18] sm:$0xff] }
  0x3f   :  { %890 = vmatprep.subr.bf16.mxu1 %v974_v25  ;;  %v789_v10 = vcombine.low %v51_v9, %v51_v9  ;;  %v790_v11 = vcombine.high %v51_v9, %v51_v9 }
  0x41   :  { %869 = vmatpush3.bf16.msra.mxu0 %v975_v26 }
  0x42   :  { %891 = vmatpush3.bf16.msra.mxu1 %v976_v27  ;;  %870 = vmatprep.subr.bf16.mxu0 %v977_v28 }
  0x43   :  { %892 = vmatprep.subr.bf16.mxu1 %v978_v29 }
  0x45   :  { %871 = vmatpush3.bf16.msra.mxu0 %v979_v30 }
  0x46   :  { %893 = vmatpush3.bf16.msra.mxu1 %v980_v31  ;;  %900 = vmatprep.subr.bf16.mxu0 %v985_v38 }
  0x47   :  { %922 = vmatprep.subr.bf16.mxu1 %v986_v39 }
  0x48   :  { %625 = vmatmul.mubr.bf16.vlgmr.msra.gmra.mrb[0].mxu0 %v783_v34  ;;  %v855_v34 = vld [vmem:[%s1166_s2] ss:$0 sm:$0xff] }
  0x49   :  { %665 = vmatmul.mubr.bf16.vlgmr.msra.gmra.mrb[0].mxu1 %v785_v36  ;;  %901 = vmatpush3.bf16.msra.mxu0 %v987_v40 }
  0x4a   :  { %923 = vmatpush3.bf16.msra.mxu1 %v988_v41  ;;  %902 = vmatprep.subr.bf16.mxu0 %v989_v42 }
  0x4b   :  { %924 = vmatprep.subr.bf16.mxu1 %v990_v43  ;;  %704 = vmatprep.mubr.bf16.mxu0 %v788_v8 }
  0x4c   :  { %744 = vmatprep.mubr.bf16.mxu1 %v790_v11 }
  0x4d   :  { %903 = vmatpush3.bf16.msra.mxu0 %v991_v44 }
  0x4e   :  { %925 = vmatpush3.bf16.msra.mxu1 %v992_v45  ;;  %904 = vmatprep.subr.bf16.mxu0 %v993_v46 }
  0x4f   :  { %926 = vmatprep.subr.bf16.mxu1 %v994_v47 }
  0x51   :  { %905 = vmatpush3.bf16.msra.mxu0 %v995_v48 }
  0x52   :  { %927 = vmatpush3.bf16.msra.mxu1 %v996_v49  ;;  %906 = vmatprep.subr.bf16.mxu0 %v997_v50 }
  0x53   :  { %928 = vmatprep.subr.bf16.mxu1 %v998_v51 }
  0x55   :  { %907 = vmatpush3.bf16.msra.mxu0 %v999_v52 }
  0x56   :  { %929 = vmatpush3.bf16.msra.mxu1 %v1000_v53  ;;  %908 = vmatprep.subr.bf16.mxu0 %v1001_v54 }
  0x57   :  { %930 = vmatprep.subr.bf16.mxu1 %v1002_v55 }
  0x59   :  { %909 = vmatpush3.bf16.msra.mxu0 %v1003_v56 }
  0x5a   :  { %931 = vmatpush3.bf16.msra.mxu1 %v1004_v57  ;;  %910 = vmatprep.subr.bf16.mxu0 %v1005_v58 }
  0x5b   :  { %932 = vmatprep.subr.bf16.mxu1 %v1006_v59 }
  0x5d   :  { %911 = vmatpush3.bf16.msra.mxu0 %v1007_v60 }
  0x5e   :  { %933 = vmatpush3.bf16.msra.mxu1 %v1008_v61  ;;  %912 = vmatprep.subr.bf16.mxu0 %v1009_v62 }
  0x5f   :  { %934 = vmatprep.subr.bf16.mxu1 %v1010_v63 }
  0x61   :  { %913 = vmatpush3.bf16.msra.mxu0 %v1011_v0 }
  0x62   :  { %935 = vmatpush3.bf16.msra.mxu1 %v1012_v1  ;;  %914 = vmatprep.subr.bf16.mxu0 %v1013_v2 }
  0x63   :  { %936 = vmatprep.subr.bf16.mxu1 %v1014_v3 }
  0x65   :  { %915 = vmatpush3.bf16.msra.mxu0 %v1015_v4 }
  0x66   :  { %937 = vmatpush3.bf16.msra.mxu1 %v1016_v5 }
  0x68   :  { %705 = vmatmul.mubr.bf16.vlgmr.msra.gmra.mrb[4].mxu0 %v787_v7 }
  0x69   :  { %745 = vmatmul.mubr.bf16.vlgmr.msra.gmra.mrb[4].mxu1 %v789_v10 }
 0x11b   :  { %v872_v12 = vpop.f32.mrb[0].mxu0 }
 0x11c   :  { %v894_v13 = vpop.f32.mrb[0].mxu1  ;;  %v873_v14 = vpop.f32.mrb[1].mxu0 }
 0x11d   :  { %v895_v15 = vpop.f32.mrb[1].mxu1  ;;  %v874_v16 = vadd.f32 %v873_v14, %v872_v12  ;;  %v875_v18 = vpop.f32.mrb[2].mxu0 }
 0x11e   :  { %v896_v17 = vadd.f32 %v895_v15, %v894_v13  ;;  %v897_v19 = vpop.f32.mrb[2].mxu1  ;;  %v876_v20 = vpop.f32.mrb[3].mxu0 }
 0x11f   :  { %v898_v21 = vpop.f32.mrb[3].mxu1 }
 0x120   :  { %v667_v22 = vadd.f32 %v896_v17, %v874_v16 }
 0x13b   :  { %v916_v23 = vpop.f32.mrb[4].mxu0 }
 0x13c   :  { %v938_v24 = vpop.f32.mrb[4].mxu1  ;;  %v917_v25 = vpop.f32.mrb[5].mxu0 }
 0x13d   :  { %v939_v26 = vpop.f32.mrb[5].mxu1  ;;  %v918_v27 = vadd.f32 %v917_v25, %v916_v23  ;;  %v919_v29 = vpop.f32.mrb[6].mxu0 }
 0x13e   :  { %v940_v28 = vadd.f32 %v939_v26, %v938_v24  ;;  %v941_v30 = vpop.f32.mrb[6].mxu1  ;;  %v920_v31 = vpop.f32.mrb[7].mxu0 }
 0x13f   :  { %v942_v32 = vpop.f32.mrb[7].mxu1  ;;  %v707_v33 = vadd.f32 %v918_v27, %v667_v22 }
 0x141   :  { %v747_v35 = vadd.f32 %v940_v28, %v707_v33 }
 0x143   :  { %v765_v36 = vadd.f32 %v855_v34, %v747_v35 }
 0x145   :  { %766 = vst [vmem:[#allocation8] sm:$0xff] %v765_v36 }
 0x146   :  { %1076 = shalt.err (!%p1073_p6)
}
 0x147   :  { %s1077_s16 = scalar_lea.hbm %s1167_s3, 128 }
 0x148   :  { %p1078_p7 = scmp.ne.s32.totalorder %s1167_s3, %s1077_s16  ;;  %p1081_p8 = scmp.lt.u32.totalorder %s1077_s16, %s1167_s3 }
 0x14a   :  { %p1083_p9 = pnand %p1081_p8, %p1078_p7 }
 0x14c   :  { %1086 = shalt.err (!%p1083_p9)
}
 0x14d   :  { %776 = dma.vmem_to_hbm [thread:$0]  %s774_s12, 128, %s1167_s3, [#allocation5]  }
 0x14e   :  { %1091 = dma.done.wait [#allocation5], 128  }
 0x14f   :  { %1092 = vsyncadd [#allocation5], 4294967168 }
 0x150   :  { %780 = vsyncpa [#allocation4], 1 }
 0x151   :  { %781 = vsyncpa [#allocation7], 1 }
 0x152   :  { %782 = vsyncpa [#allocation5], 1 }

</bundles_post_ra>
